<compile_context>
chip_gen: v7x
topology: tpu7x:2x2x1
jax: 0.10.0
libtpu: 0.0.40
codegen_flags: <defaults>
</compile_context>

<pallas_src>
import jax
import jax.numpy as jnp
from jax.experimental import pallas as pl
from jax.experimental.pallas import tpu as pltpu


def _copy_kernel(in_ref, out_ref):
    # Pure streamed copy of the current (rows, lanes) tile.
    out_ref[...] = in_ref[...]


def _pick_lane(total, target=4096):
    """Largest multiple-of-128 lane width that divides `total`, preferring a
    width <= target that still leaves >= 8 rows (full sublane usage).
    Returns None if no multiple of 128 divides total."""
    candidates = [l for l in (8192, 4096, 2048, 1024, 512, 256, 128)
                  if total % l == 0]
    if not candidates:
        return None
    for l in candidates:                      # descending
        if l <= target and total // l >= 8:
            return l
    return candidates[0]                      # tiny tensors: flattest layout


def _streamed_copy_2d(x2d, target_tile_bytes=4 << 20):
    """HBM->HBM identity copy of a 2-D slab, row-tiled, in/out aliased."""
    rows, lane = x2d.shape
    itemsize = jnp.dtype(x2d.dtype).itemsize

    if rows * lane * itemsize <= target_tile_bytes:
        tr = rows                             # single full block (always legal)
    else:
        tr = max(8, (target_tile_bytes // (lane * itemsize)) // 8 * 8)
        tr = min(rows, tr)

    cost = pl.CostEstimate(flops=0, transcendentals=0,
                           bytes_accessed=2 * rows * lane * itemsize)

    return pl.pallas_call(
        _copy_kernel,
        out_shape=jax.ShapeDtypeStruct((rows, lane), x2d.dtype),
        grid=(pl.cdiv(rows, tr),),
        in_specs=[pl.BlockSpec((tr, lane), lambda i: (i, 0))],
        out_specs=pl.BlockSpec((tr, lane), lambda i: (i, 0)),
        input_output_aliases={0: 0},
        compiler_params=pltpu.CompilerParams(
            dimension_semantics=("parallel",),
            vmem_limit_bytes=48 << 20),
        cost_estimate=cost,
    )(x2d)


def shaped_unflatten(inp, channels=1, height=1, width=1,
                     use_pallas_copy=False):
    """inp: [N, ...] with prod(trailing dims) == channels*height*width.

    Returns [N, channels, height, width] in inp's native dtype.
    By default this is a zero-cost metadata reshape (matching .view()).
    Set use_pallas_copy=True to force a materializing Pallas streamed copy.
    """
    n = inp.shape[0]
    d = channels * height * width
    assert inp.size == n * d, (
        f"cannot view {inp.shape} as ({n}, {channels}, {height}, {width})")

    if not use_pallas_copy:
        # .view() == metadata-only row-major reshape; no kernel needed.
        return inp.reshape(n, channels, height, width)

    total = n * d
    lane = _pick_lane(total)
    if lane is not None:
        # Lane-dense 1-D stream decoupled from (N, C*H*W): unmasked stores.
        x2d = inp.reshape(total // lane, lane)
    else:
        # Fallback: element count not a multiple of 128; keep full-width rows
        # (full-extent lane block is always legal), only the row edge masks.
        x2d = inp.reshape(n, d)

    out2d = _streamed_copy_2d(x2d)

    # Free metadata reshape to the target NCHW view.
    return out2d.reshape(n, channels, height, width)


if __name__ == "__main__":
    key = jax.random.PRNGKey(0)

    N, C, H, W = 2, 4, 16, 16
    # The module typically receives a flattened [N, C*H*W] activation.
    inp = jax.random.normal(key, (N, C * H * W), dtype=jnp.float32)

    ref = inp.reshape(N, C, H, W)

    # Default (recommended) path: pure metadata reshape, zero HBM traffic.
    out_fast = jax.block_until_ready(
        shaped_unflatten(inp, channels=C, height=H, width=W))

    # Pallas streamed-copy path (kept behind a flag per the review); run it
    # once so the kernel itself is exercised on the TPU.
    out_kernel = jax.block_until_ready(
        shaped_unflatten(inp, channels=C, height=H, width=W,
                         use_pallas_copy=True))

    for out in (out_fast, out_kernel):
        assert out.shape == (N, C, H, W)
        assert out.dtype == inp.dtype
        assert jnp.array_equal(out, ref)

    print("KERNEL_OK")
</pallas_src>

<mosaic_0001>
module attributes {stable_mosaic.version = 11 : i64} {
  func.func @_copy_kernel(%arg0: i32, %arg1: memref<8x256xf32, #tpu.memory_space<vmem>>, %arg2: memref<8x256xf32, #tpu.memory_space<vmem>>) attributes {dimension_semantics = [#tpu.dimension_semantics<parallel>], iteration_bounds = array<i64: 1>, scalar_prefetch = 0 : i64, scratch_operands = 0 : i64, tpu.core_type = #tpu.core_type<tc>, window_params = [{transform_indices = @transform_0, window_bounds = array<i64: 8, 256>}, {transform_indices = @transform_1, window_bounds = array<i64: 8, 256>}]} {
    %c0 = arith.constant 0 : index
    %c0_0 = arith.constant 0 : index
    %0 = vector.load %arg1[%c0, %c0_0] : memref<8x256xf32, #tpu.memory_space<vmem>>, vector<8x256xf32>
    %c0_1 = arith.constant 0 : index
    %c0_2 = arith.constant 0 : index
    %1 = vector.load %arg2[%c0_1, %c0_2] : memref<8x256xf32, #tpu.memory_space<vmem>>, vector<8x256xf32>
    tpu.vector_store %arg2[%c0_1, %c0_2], %0 {strides = array<i32>} : memref<8x256xf32, #tpu.memory_space<vmem>>, vector<8x256xf32>,
    return
  }
  func.func @transform_0(%arg0: i32) -> (i32, i32) {
    %c0_i32 = arith.constant 0 : i32
    %c0_i32_0 = arith.constant 0 : i32
    return %arg0, %c0_i32 : i32, i32
  }
  func.func @transform_1(%arg0: i32) -> (i32, i32) {
    %c0_i32 = arith.constant 0 : i32
    %c0_i32_0 = arith.constant 0 : i32
    return %arg0, %c0_i32 : i32, i32
  }
}

</mosaic_0001>

<bundles_post_ra>
// kernel: tpu_custom_call.1
= control target key start
LH: loop header
LB: loop body
LE: loop exit
PB: predicated region body
PF: predicated region fallthrough
CT: control target
= control target key end

     0   :  { %6 = vsyncpa [#allocation3], 0  ;;  %s126_s0 = inlined_call_operand.hbm [shape: f32[8,256], index: 0, kind: input, shape index: {}, may-alias: {0,1}]   ;;  %s127_s1 = inlined_call_operand.hbm [shape: f32[8,256], index: 1, kind: output, shape index: {}, may-alias: {0,1}]  }
   0x1   :  { %7 = vsyncpa [#allocation4], 0  ;;  %s90_s6 = smov [#allocation2]   ;;  %s42_s10 = scalar_lea.hbm %s126_s0, 256 }
   0x2   :  { %s14_s7 = sshll.u32 %s90_s6, 4  ;;  %p43_p0 = scmp.ne.s32.totalorder %s126_s0, %s42_s10  ;;  %s15_s7 = int_to_ptr.vmem [resolvable:$true] %s14_s7 }
   0x3   :  { %p46_p1 = scmp.lt.u32.totalorder %s42_s10, %s126_s0 }
   0x5   :  { %p48_p2 = pnand %p46_p1, %p43_p0 }
   0x7   :  { %51 = shalt.err (!%p48_p2)
}
   0x8   :  { %s52_s15 = scalar_lea.vmem %s15_s7, 256  ;;  %p57_p4 = scmp.lt.s32.totalorder %s15_s7, %s15_s7 }
   0x9   :  { %p53_p3 = scmp.ne.s32.totalorder %s15_s7, %s52_s15  ;;  %p58_p5 = scmp.lt.s32.totalorder %s52_s15, %s52_s15 }
   0xb   :  { %p59_p6 = por %p58_p5, %p57_p4 }
   0xd   :  { %p60_p7 = pnand %p59_p6, %p53_p3 }
   0xf   :  { %63 = shalt.err (!%p60_p7)
}
  0x10   :  { %17 = dma.hbm_to_vmem [thread:$0]  %s126_s0, 256, %s15_s7, [#allocation3]  }
  0x11   :  { %86 = dma.done.wait [#allocation3], 256  }
  0x12   :  { %87 = vsyncadd [#allocation3], 4294967040  ;;  %s91_s18 = smov [#allocation5]   ;;  %v21_v0 = vld [vmem:[#allocation2] sm:$0xff]  ;;  %v22_v1 = vld [vmem:[#allocation2 + $0x8] sm:$0xff] }
  0x13   :  { %s31_s19 = sshll.u32 %s91_s18, 4  ;;  %23 = vst [vmem:[#allocation5] sm:$0xff] %v21_v0  ;;  %24 = vst [vmem:[#allocation5 + $0x8] sm:$0xff] %v22_v1  ;;  %s32_s19 = int_to_ptr.vmem [resolvable:$true] %s31_s19 }
  0x14   :  { %s64_s20 = scalar_lea.vmem %s32_s19, 256  ;;  %p69_p9 = scmp.lt.s32.totalorder %s32_s19, %s32_s19 }
  0x15   :  { %p65_p8 = scmp.ne.s32.totalorder %s32_s19, %s64_s20  ;;  %p70_p10 = scmp.lt.s32.totalorder %s64_s20, %s64_s20 }
  0x17   :  { %p71_p11 = por %p70_p10, %p69_p9 }
  0x19   :  { %p72_p12 = pnand %p71_p11, %p65_p8 }
  0x1b   :  { %75 = shalt.err (!%p72_p12)
}
  0x1c   :  { %s76_s0 = scalar_lea.hbm %s127_s1, 256 }
  0x1d   :  { %p77_p13 = scmp.ne.s32.totalorder %s127_s1, %s76_s0  ;;  %p80_p0 = scmp.lt.u32.totalorder %s76_s0, %s127_s1 }
  0x1f   :  { %p82_p1 = pnand %p80_p0, %p77_p13 }
  0x21   :  { %85 = shalt.err (!%p82_p1)
}
  0x22   :  { %34 = dma.vmem_to_hbm [thread:$0]  %s32_s19, 256, %s127_s1, [#allocation4]  }
  0x23   :  { %88 = dma.done.wait [#allocation4], 256  }
  0x24   :  { %89 = vsyncadd [#allocation4], 4294967040 }
  0x25   :  { %38 = vsyncpa [#allocation3], 1 }
  0x26   :  { %39 = vsyncpa [#allocation4], 1 }

</bundles_post_ra>
